<compile_context>
chip_gen: v7x
topology: tpu7x:2x2x1
jax: 0.10.0
libtpu: 0.0.40
codegen_flags: <defaults>
</compile_context>

<pallas_src>
import functools

import jax
import jax.numpy as jnp
from jax.experimental import pallas as pl
from jax.experimental.pallas import tpu as pltpu


def _round_up(x, m):
    return (x + m - 1) // m * m


def _pad2(x, rows, cols):
    return jnp.pad(x, ((0, rows - x.shape[0]), (0, cols - x.shape[1])))


def _pick_tile(np128, want):
    """Largest multiple of 128 that divides np128 and is <= want (always >= 128)."""
    best = 128
    t = 256
    while t <= min(want, np128):
        if np128 % t == 0:
            best = t
        t += 128
    return best


# ---------------------------------------------------------------------------
# Pre-pass kernel: HW = H @ W^T  (row-tiled, runs once per layer)
# ---------------------------------------------------------------------------
def _xw_kernel(h_ref, wt_ref, o_ref):
    o_ref[...] = jnp.dot(h_ref[...], wt_ref[...],
                         preferred_element_type=jnp.float32).astype(o_ref.dtype)


def _feature_transform(h_p, wt_p, *, tm):
    np_, fin_p = h_p.shape
    fout_p = wt_p.shape[1]
    grid_m = np_ // tm
    return pl.pallas_call(
        _xw_kernel,
        out_shape=jax.ShapeDtypeStruct((np_, fout_p), jnp.bfloat16),
        grid_spec=pltpu.PrefetchScalarGridSpec(
            num_scalar_prefetch=0,
            grid=(grid_m,),
            in_specs=[
                pl.BlockSpec((tm, fin_p), lambda i: (i, 0)),
                pl.BlockSpec((fin_p, fout_p), lambda i: (0, 0)),
            ],
            out_specs=pl.BlockSpec((tm, fout_p), lambda i: (i, 0)),
        ),
        compiler_params=pltpu.CompilerParams(
            dimension_semantics=("parallel",),
            vmem_limit_bytes=48 * 1024 * 1024,
        ),
        cost_estimate=pl.CostEstimate(
            flops=2 * np_ * fin_p * fout_p,
            transcendentals=0,
            bytes_accessed=2 * np_ * fin_p + 2 * grid_m * fin_p * fout_p
                           + 2 * np_ * fout_p),
    )(h_p, wt_p)


# ---------------------------------------------------------------------------
# Main kernels: aggregation over the graph + bias + ReLU
# ---------------------------------------------------------------------------
def _agg_bias_relu_kernel(a_ref, hw_ref, b_ref, o_ref, acc_ref):
    # Hoisted path: acc += A_ik @ HW_k ; epilogue: relu(acc + b)
    k = pl.program_id(1)

    @pl.when(k == 0)
    def _init():
        acc_ref[...] = jnp.zeros_like(acc_ref)

    a = a_ref[...].astype(jnp.float32).astype(jnp.bfloat16)  # int8 0/1 -> bf16, exact
    acc_ref[...] += jnp.dot(a, hw_ref[...], preferred_element_type=jnp.float32)

    @pl.when(k == pl.num_programs(1) - 1)
    def _finalize():
        o_ref[...] = jnp.maximum(acc_ref[...] + b_ref[...], 0.0).astype(o_ref.dtype)


def _agg_linear_bias_relu_kernel(a_ref, h_ref, wt_ref, b_ref, o_ref, acc_ref):
    # Fallback path (Fout_p > Fin_p): acc += A_ik @ H_k ; epilogue: relu(acc @ W^T + b)
    k = pl.program_id(1)

    @pl.when(k == 0)
    def _init():
        acc_ref[...] = jnp.zeros_like(acc_ref)

    a = a_ref[...].astype(jnp.float32).astype(jnp.bfloat16)
    acc_ref[...] += jnp.dot(a, h_ref[...], preferred_element_type=jnp.float32)

    @pl.when(k == pl.num_programs(1) - 1)
    def _finalize():
        lin = jnp.dot(acc_ref[...].astype(jnp.bfloat16), wt_ref[...],
                      preferred_element_type=jnp.float32)
        o_ref[...] = jnp.maximum(lin + b_ref[...], 0.0).astype(o_ref.dtype)


def gcn_layer(adj_i8, h_p, wt_p, b_p, *, tm, tk):
    """relu((A @ h_p) @ wt_p + b_p) with tiled/pipelined Pallas. All inputs padded."""
    np_ = adj_i8.shape[0]
    fin_p = h_p.shape[1]
    fout_p = wt_p.shape[1]
    assert np_ % tm == 0 and np_ % tk == 0
    grid_m = np_ // tm
    grid_k = np_ // tk

    # Hoist H @ W^T whenever it does not widen the streamed operand / accumulator.
    # (On v5e's 128-wide MXU this is also a genuine MXU-time win for wide-Fin layers;
    #  on v6e/v7x's 256-wide MXU the win is HBM bytes, captured by the pre-pass.)
    hoist = fout_p <= fin_p

    if hoist:
        hw_p = _feature_transform(h_p, wt_p, tm=tm)
        kernel = _agg_bias_relu_kernel
        in_specs = [
            pl.BlockSpec((tm, tk), lambda i, k: (i, k)),          # A tile (int8)
            pl.BlockSpec((tk, fout_p), lambda i, k: (k, 0)),      # HW tile
            pl.BlockSpec((1, fout_p), lambda i, k: (0, 0)),       # bias
        ]
        operands = (adj_i8, hw_p, b_p)
        acc_w = fout_p
        flops = 2 * np_ * np_ * fout_p
        bytes_accessed = (np_ * np_ + 2 * grid_m * np_ * fout_p
                          + 2 * np_ * fout_p + 4 * fout_p)
    else:
        kernel = _agg_linear_bias_relu_kernel
        in_specs = [
            pl.BlockSpec((tm, tk), lambda i, k: (i, k)),          # A tile (int8)
            pl.BlockSpec((tk, fin_p), lambda i, k: (k, 0)),       # H tile
            pl.BlockSpec((fin_p, fout_p), lambda i, k: (0, 0)),   # W^T (resident)
            pl.BlockSpec((1, fout_p), lambda i, k: (0, 0)),       # bias
        ]
        operands = (adj_i8, h_p, wt_p, b_p)
        acc_w = fin_p
        flops = 2 * np_ * np_ * fin_p + 2 * np_ * fin_p * fout_p
        bytes_accessed = (np_ * np_ + 2 * grid_m * np_ * fin_p
                          + 2 * fin_p * fout_p + 2 * np_ * fout_p + 4 * fout_p)

    return pl.pallas_call(
        kernel,
        out_shape=jax.ShapeDtypeStruct((np_, fout_p), jnp.bfloat16),
        grid_spec=pltpu.PrefetchScalarGridSpec(
            num_scalar_prefetch=0,
            grid=(grid_m, grid_k),
            in_specs=in_specs,
            out_specs=pl.BlockSpec((tm, fout_p), lambda i, k: (i, 0)),
            scratch_shapes=[pltpu.VMEM((tm, acc_w), jnp.float32)],
        ),
        compiler_params=pltpu.CompilerParams(
            dimension_semantics=("parallel", "arbitrary"),
            # <= 48 MiB keeps the plan inside v7x's 64 MiB physical VMEM.
            vmem_limit_bytes=48 * 1024 * 1024,
        ),
        cost_estimate=pl.CostEstimate(
            flops=flops, transcendentals=0, bytes_accessed=bytes_accessed),
    )(*operands)


def _prep_linear(w, b):
    """Pre-transpose + zero-pad nn.Linear params to lane-dense padded shapes."""
    fo, fi = w.shape
    fi_p = _round_up(fi, 128)
    fo_p = _round_up(fo, 128)
    wt_p = _pad2(jnp.asarray(w, jnp.float32).T, fi_p, fo_p).astype(jnp.bfloat16)
    b_p = _pad2(jnp.asarray(b, jnp.float32).reshape(1, fo), 1, fo_p)
    return wt_p, b_p


@functools.partial(jax.jit, static_argnames=("n_layers", "tm", "tk"))
def gcn_forward(adj, features, params, n_layers, *, tm=1024, tk=512):
    """Full GCN forward: L1 -> (n_layers-2) x L2 -> L3, ReLU after each layer."""
    assert tm % 128 == 0 and tk % 128 == 0
    n = adj.shape[0]
    n_classes = params["w3"].shape[0]

    # Padding plan: pad N once to a multiple of 128 (no lcm blow-up); choose tiles as
    # the largest multiples of 128 that divide the padded N (<= requested sizes).
    np_ = _round_up(n, 128)
    tm_ = _pick_tile(np_, tm)
    tk_ = _pick_tile(np_, tk)
    # v7x megacore: prefer >= 2 row blocks so the "parallel" axis splits across cores.
    if np_ // tm_ < 2:
        half = _pick_tile(np_, max(128, np_ // 2))
        if np_ // half >= 2:
            tm_ = half

    fin_p = _round_up(features.shape[1], 128)
    # A stored as int8 (0/1) in HBM; cast to bf16 in-kernel -> half the dominant stream.
    adj_i8 = _pad2(jnp.asarray(adj, jnp.float32), np_, np_).astype(jnp.int8)
    x = _pad2(jnp.asarray(features, jnp.float32), np_, fin_p).astype(jnp.bfloat16)

    wt1, b1 = _prep_linear(params["w1"], params["b1"])
    wt2, b2 = _prep_linear(params["w2"], params["b2"])
    wt3, b3 = _prep_linear(params["w3"], params["b3"])

    x = gcn_layer(adj_i8, x, wt1, b1, tm=tm_, tk=tk_)
    for _ in range(n_layers - 2):
        x = gcn_layer(adj_i8, x, wt2, b2, tm=tm_, tk=tk_)
        # dropout: identity (eval-mode inference).
    x = gcn_layer(adj_i8, x, wt3, b3, tm=tm_, tk=tk_)
    return x[:n, :n_classes].astype(jnp.float32)


def _init_linear(key, out_feats, in_feats):
    # Mimics nn.Linear's uniform(-1/sqrt(in), 1/sqrt(in)) init.
    kw, kb = jax.random.split(key)
    bound = 1.0 / jnp.sqrt(jnp.float32(in_feats))
    w = jax.random.uniform(kw, (out_feats, in_feats), jnp.float32, -bound, bound)
    b = jax.random.uniform(kb, (out_feats,), jnp.float32, -bound, bound)
    return w, b


def _ref_forward(adj, features, params, n_layers):
    """Plain-JAX reference mirroring the kernel's bf16/f32 numerics and association."""
    a = adj.astype(jnp.bfloat16)

    def layer(h, w, b):
        fi_p = _round_up(w.shape[1], 128)
        fo_p = _round_up(w.shape[0], 128)
        hb = h.astype(jnp.bfloat16)
        wt = w.T.astype(jnp.bfloat16)
        if fo_p <= fi_p:  # hoisted / reassociated order
            hw = jnp.dot(hb, wt, preferred_element_type=jnp.float32).astype(jnp.bfloat16)
            lin = jnp.dot(a, hw, preferred_element_type=jnp.float32) + b
        else:
            agg = jnp.dot(a, hb, preferred_element_type=jnp.float32).astype(jnp.bfloat16)
            lin = jnp.dot(agg, wt, preferred_element_type=jnp.float32) + b
        return jnp.maximum(lin, 0.0).astype(jnp.bfloat16)

    x = layer(features, params["w1"], params["b1"])
    for _ in range(n_layers - 2):
        x = layer(x, params["w2"], params["b2"])
    x = layer(x, params["w3"], params["b3"])
    return x.astype(jnp.float32)


if __name__ == "__main__":
    key = jax.random.PRNGKey(0)
    k_adj, k_feat, k1, k2, k3 = jax.random.split(key, 5)

    # Small synthetic graph. Intentionally non-aligned sizes to exercise padding,
    # and small requested tiles so the 3x3 grid exercises row/K tiling + the
    # pl.when init/epilogue across the reduction axis.
    n_nodes = 300
    in_feats = 200    # pads to 256 -> layer 1 uses the hoisted (A @ (H W^T)) path
    n_hidden = 64     # pads to 128
    n_classes = 10
    n_layers = 4

    # Dense adjacency: A[dst, src] = 1 for each directed edge src -> dst.
    adj = (jax.random.uniform(k_adj, (n_nodes, n_nodes)) < 0.1).astype(jnp.float32)
    features = jax.random.normal(k_feat, (n_nodes, in_feats), jnp.float32)

    w1, b1 = _init_linear(k1, n_hidden, in_feats)
    w2, b2 = _init_linear(k2, n_hidden, n_hidden)
    w3, b3 = _init_linear(k3, n_classes, n_hidden)
    params = {"w1": w1, "b1": b1, "w2": w2, "b2": b2, "w3": w3, "b3": b3}

    out = gcn_forward(adj, features, params, n_layers, tm=256, tk=128)
    out = jax.block_until_ready(out)
    assert out.shape == (n_nodes, n_classes)

    ref = _ref_forward(adj, features, params, n_layers)
    assert jnp.allclose(out, ref, rtol=2e-2, atol=2e-2), (
        float(jnp.max(jnp.abs(out - ref))))

    print("KERNEL_OK")
</pallas_src>

<mosaic_0001>
module attributes {stable_mosaic.version = 11 : i64} {
  func.func @_agg_bias_relu_kernel(%arg0: i32, %arg1: i32, %arg2: memref<128x128xi8, #tpu.memory_space<vmem>>, %arg3: memref<128x128xbf16, #tpu.memory_space<vmem>>, %arg4: memref<1x128xf32, #tpu.memory_space<vmem>>, %arg5: memref<128x128xbf16, #tpu.memory_space<vmem>>, %arg6: memref<128x128xf32, #tpu.memory_space<vmem>>) attributes {dimension_semantics = [#tpu.dimension_semantics<parallel>, #tpu.dimension_semantics<arbitrary>], iteration_bounds = array<i64: 3, 3>, scalar_prefetch = 0 : i64, scratch_operands = 1 : i64, tpu.core_type = #tpu.core_type<tc>, window_params = [{transform_indices = @transform_0, window_bounds = array<i64: 128, 128>}, {transform_indices = @transform_1, window_bounds = array<i64: 128, 128>}, {pipeline_mode = #tpu.pipeline_mode<synchronous>, transform_indices = @transform_2, window_bounds = array<i64: 1, 128>}, {transform_indices = @transform_3, window_bounds = array<i64: 128, 128>}]} {
    %c0_i32 = arith.constant 0 : i32
    %0 = arith.cmpi eq, %arg1, %c0_i32 : i32
    %1 = arith.extui %0 : i1 to i32
    %c0_i32_0 = arith.constant 0 : i32
    %2 = arith.cmpi ne, %1, %c0_i32_0 : i32
    scf.if %2 {
      %cst_9 = arith.constant 0.000000e+00 : f32
      %14 = vector.broadcast %cst_9 : f32 to vector<128x128xf32>
      %c0_10 = arith.constant 0 : index
      %c0_11 = arith.constant 0 : index
      %15 = vector.load %arg6[%c0_10, %c0_11] : memref<128x128xf32, #tpu.memory_space<vmem>>, vector<128x128xf32>
      tpu.vector_store %arg6[%c0_10, %c0_11], %14 {strides = array<i32>} : memref<128x128xf32, #tpu.memory_space<vmem>>, vector<128x128xf32>,
    } else {
    }
    %c0 = arith.constant 0 : index
    %c0_1 = arith.constant 0 : index
    %3 = vector.load %arg2[%c0, %c0_1] : memref<128x128xi8, #tpu.memory_space<vmem>>, vector<128x128xi8>
    %4 = arith.sitofp %3 : vector<128x128xi8> to vector<128x128xf32>
    %5 = arith.truncf %4 : vector<128x128xf32> to vector<128x128xbf16>
    %c0_2 = arith.constant 0 : index
    %c0_3 = arith.constant 0 : index
    %6 = vector.load %arg6[%c0_2, %c0_3] : memref<128x128xf32, #tpu.memory_space<vmem>>, vector<128x128xf32>
    %c0_4 = arith.constant 0 : index
    %c0_5 = arith.constant 0 : index
    %7 = vector.load %arg3[%c0_4, %c0_5] : memref<128x128xbf16, #tpu.memory_space<vmem>>, vector<128x128xbf16>
    %cst = arith.constant dense<0.000000e+00> : vector<128x128xf32>
    %8 = tpu.matmul %5, %7, %cst {dimension_numbers = #tpu.dot_dimension_numbers<[1], [0], [0], [1], [0, 0, 1, 1], [], []>} : vector<128x128xbf16>, vector<128x128xbf16>, vector<128x128xf32> -> vector<128x128xf32>
    %9 = arith.addf %6, %8 : vector<128x128xf32>
    %c0_6 = arith.constant 0 : index
    %c0_7 = arith.constant 0 : index
    %10 = vector.load %arg6[%c0_6, %c0_7] : memref<128x128xf32, #tpu.memory_space<vmem>>, vector<128x128xf32>
    tpu.vector_store %arg6[%c0_6, %c0_7], %9 {strides = array<i32>} : memref<128x128xf32, #tpu.memory_space<vmem>>, vector<128x128xf32>,
    %c2_i32 = arith.constant 2 : i32
    %11 = arith.cmpi eq, %arg1, %c2_i32 : i32
    %12 = arith.extui %11 : i1 to i32
    %c0_i32_8 = arith.constant 0 : i32
    %13 = arith.cmpi ne, %12, %c0_i32_8 : i32
    scf.if %13 {
      %c0_9 = arith.constant 0 : index
      %c0_10 = arith.constant 0 : index
      %14 = vector.load %arg6[%c0_9, %c0_10] : memref<128x128xf32, #tpu.memory_space<vmem>>, vector<128x128xf32>
      %c0_11 = arith.constant 0 : index
      %c0_12 = arith.constant 0 : index
      %15 = vector.load %arg4[%c0_11, %c0_12] : memref<1x128xf32, #tpu.memory_space<vmem>>, vector<1x128xf32>
      %16 = vector.broadcast %15 : vector<1x128xf32> to vector<128x128xf32>
      %17 = arith.addf %14, %16 : vector<128x128xf32>
      %cst_13 = arith.constant 0.000000e+00 : f32
      %18 = vector.broadcast %cst_13 : f32 to vector<128x128xf32>
      %19 = arith.maximumf %17, %18 : vector<128x128xf32>
      %20 = arith.truncf %19 : vector<128x128xf32> to vector<128x128xbf16>
      %c0_14 = arith.constant 0 : index
      %c0_15 = arith.constant 0 : index
      %21 = vector.load %arg5[%c0_14, %c0_15] : memref<128x128xbf16, #tpu.memory_space<vmem>>, vector<128x128xbf16>
      tpu.vector_store %arg5[%c0_14, %c0_15], %20 {strides = array<i32>} : memref<128x128xbf16, #tpu.memory_space<vmem>>, vector<128x128xbf16>,
    } else {
    }
    return
  }
  func.func @transform_0(%arg0: i32, %arg1: i32) -> (i32, i32) {
    %c0_i32 = arith.constant 0 : i32
    return %arg0, %arg1 : i32, i32
  }
  func.func @transform_1(%arg0: i32, %arg1: i32) -> (i32, i32) {
    %c0_i32 = arith.constant 0 : i32
    %c0_i32_0 = arith.constant 0 : i32
    return %arg1, %c0_i32 : i32, i32
  }
  func.func @transform_2(%arg0: i32, %arg1: i32) -> (i32, i32) {
    %c0_i32 = arith.constant 0 : i32
    %c0_i32_0 = arith.constant 0 : i32
    %c0_i32_1 = arith.constant 0 : i32
    return %c0_i32, %c0_i32_0 : i32, i32
  }
  func.func @transform_3(%arg0: i32, %arg1: i32) -> (i32, i32) {
    %c0_i32 = arith.constant 0 : i32
    %c0_i32_0 = arith.constant 0 : i32
    return %arg0, %c0_i32 : i32, i32
  }
}

module attributes {stable_mosaic.version = 11 : i64} {
  func.func @_xw_kernel(%arg0: i32, %arg1: memref<128x256xbf16, #tpu.memory_space<vmem>>, %arg2: memref<256x128xbf16, #tpu.memory_space<vmem>>, %arg3: memref<128x128xbf16, #tpu.memory_space<vmem>>) attributes {dimension_semantics = [#tpu.dimension_semantics<parallel>], iteration_bounds = array<i64: 3>, scalar_prefetch = 0 : i64, scratch_operands = 0 : i64, tpu.core_type = #tpu.core_type<tc>, window_params = [{transform_indices = @transform_0, window_bounds = array<i64: 128, 256>}, {pipeline_mode = #tpu.pipeline_mode<synchronous>, transform_indices = @transform_1, window_bounds = array<i64: 256, 128>}, {transform_indices = @transform_2, window_bounds = array<i64: 128, 128>}]} {
    %c0 = arith.constant 0 : index
    %c0_0 = arith.constant 0 : index
    %0 = vector.load %arg1[%c0, %c0_0] : memref<128x256xbf16, #tpu.memory_space<vmem>>, vector<128x256xbf16>
    %c0_1 = arith.constant 0 : index
    %c0_2 = arith.constant 0 : index
    %1 = vector.load %arg2[%c0_1, %c0_2] : memref<256x128xbf16, #tpu.memory_space<vmem>>, vector<256x128xbf16>
    %cst = arith.constant dense<0.000000e+00> : vector<128x128xf32>
    %2 = tpu.matmul %0, %1, %cst {dimension_numbers = #tpu.dot_dimension_numbers<[1], [0], [0], [1], [0, 0, 1, 1], [], []>} : vector<128x256xbf16>, vector<256x128xbf16>, vector<128x128xf32> -> vector<128x128xf32>
    %3 = arith.truncf %2 : vector<128x128xf32> to vector<128x128xbf16>
    %c0_3 = arith.constant 0 : index
    %c0_4 = arith.constant 0 : index
    %4 = vector.load %arg3[%c0_3, %c0_4] : memref<128x128xbf16, #tpu.memory_space<vmem>>, vector<128x128xbf16>
    tpu.vector_store %arg3[%c0_3, %c0_4], %3 {strides = array<i32>} : memref<128x128xbf16, #tpu.memory_space<vmem>>, vector<128x128xbf16>,
    return
  }
  func.func @transform_0(%arg0: i32) -> (i32, i32) {
    %c0_i32 = arith.constant 0 : i32
    %c0_i32_0 = arith.constant 0 : i32
    return %arg0, %c0_i32 : i32, i32
  }
  func.func @transform_1(%arg0: i32) -> (i32, i32) {
    %c0_i32 = arith.constant 0 : i32
    %c0_i32_0 = arith.constant 0 : i32
    %c0_i32_1 = arith.constant 0 : i32
    return %c0_i32, %c0_i32_0 : i32, i32
  }
  func.func @transform_2(%arg0: i32) -> (i32, i32) {
    %c0_i32 = arith.constant 0 : i32
    %c0_i32_0 = arith.constant 0 : i32
    return %arg0, %c0_i32 : i32, i32
  }
}

module attributes {stable_mosaic.version = 11 : i64} {
  func.func @_xw_kernel(%arg0: i32, %arg1: memref<128x128xbf16, #tpu.memory_space<vmem>>, %arg2: memref<128x128xbf16, #tpu.memory_space<vmem>>, %arg3: memref<128x128xbf16, #tpu.memory_space<vmem>>) attributes {dimension_semantics = [#tpu.dimension_semantics<parallel>], iteration_bounds = array<i64: 3>, scalar_prefetch = 0 : i64, scratch_operands = 0 : i64, tpu.core_type = #tpu.core_type<tc>, window_params = [{transform_indices = @transform_0, window_bounds = array<i64: 128, 128>}, {pipeline_mode = #tpu.pipeline_mode<synchronous>, transform_indices = @transform_1, window_bounds = array<i64: 128, 128>}, {transform_indices = @transform_2, window_bounds = array<i64: 128, 128>}]} {
    %c0 = arith.constant 0 : index
    %c0_0 = arith.constant 0 : index
    %0 = vector.load %arg1[%c0, %c0_0] : memref<128x128xbf16, #tpu.memory_space<vmem>>, vector<128x128xbf16>
    %c0_1 = arith.constant 0 : index
    %c0_2 = arith.constant 0 : index
    %1 = vector.load %arg2[%c0_1, %c0_2] : memref<128x128xbf16, #tpu.memory_space<vmem>>, vector<128x128xbf16>
    %cst = arith.constant dense<0.000000e+00> : vector<128x128xf32>
    %2 = tpu.matmul %0, %1, %cst {dimension_numbers = #tpu.dot_dimension_numbers<[1], [0], [0], [1], [0, 0, 1, 1], [], []>} : vector<128x128xbf16>, vector<128x128xbf16>, vector<128x128xf32> -> vector<128x128xf32>
    %3 = arith.truncf %2 : vector<128x128xf32> to vector<128x128xbf16>
    %c0_3 = arith.constant 0 : index
    %c0_4 = arith.constant 0 : index
    %4 = vector.load %arg3[%c0_3, %c0_4] : memref<128x128xbf16, #tpu.memory_space<vmem>>, vector<128x128xbf16>
    tpu.vector_store %arg3[%c0_3, %c0_4], %3 {strides = array<i32>} : memref<128x128xbf16, #tpu.memory_space<vmem>>, vector<128x128xbf16>,
    return
  }
  func.func @transform_0(%arg0: i32) -> (i32, i32) {
    %c0_i32 = arith.constant 0 : i32
    %c0_i32_0 = arith.constant 0 : i32
    return %arg0, %c0_i32 : i32, i32
  }
  func.func @transform_1(%arg0: i32) -> (i32, i32) {
    %c0_i32 = arith.constant 0 : i32
    %c0_i32_0 = arith.constant 0 : i32
    %c0_i32_1 = arith.constant 0 : i32
    return %c0_i32, %c0_i32_0 : i32, i32
  }
  func.func @transform_2(%arg0: i32) -> (i32, i32) {
    %c0_i32 = arith.constant 0 : i32
    %c0_i32_0 = arith.constant 0 : i32
    return %arg0, %c0_i32 : i32, i32
  }
}

</mosaic_0001>

<bundles_post_ra>
// kernel: gcn_forward.10
= control target key start
LH: loop header
LB: loop body
LE: loop exit
PB: predicated region body
PF: predicated region fallthrough
CT: control target
= control target key end

     0   :  { %s726_s9 = smov 0   ;;  %s784_s0 = inlined_call_operand.vmem [shape: bf16[384,128], index: 0, kind: input, shape index: {}]   ;;  %s785_s1 = inlined_call_operand.vmem [shape: bf16[128,128], index: 1, kind: input, shape index: {}]   ;;  %s786_s2 = inlined_call_operand.vmem [shape: bf16[384,128], index: 2, kind: output, shape index: {}]  }
   0x1 LB: > { %s509_s10 = sadd.s32 4294967295, %s709_s9   ;;  %p513_p0 = scmp.ge.s32.totalorder %s709_s9, 1  ;;  %s709_s9 = sphi %s726_s9, %s12_s9  }
   0x2   : > { %p113_p1 = scmp.lt.s32.totalorder %s709_s9, 4 }
   0x4   : > { %p114_p2 = pnand %p513_p0, %p113_p1 }
   0x5   : > { %v687_v0 = vld [vmem:[%s785_s1] sm:$0xff] (!%p114_p2)   ;;  %s514_s13 = sshll.u32 (!%p114_p2), %s509_s10, 4  ;;  %v688_v1 = vld [vmem:[%s785_s1 + $0x8] sm:$0xff] (!%p114_p2)   ;;  %v689_v2 = vld [vmem:[%s785_s1 + $0x10] sm:$0xff] (!%p114_p2)  }
   0x6   : > { %117 = sbr.rel (%p114_p2) target bundleno = 264 (0x108), region = 28  ;;  %p136_p3 = scmp.lt.s32.totalorder (!%p114_p2), %s514_s13, 47  ;;  %631 = vmatprep.subr.bf16.mxu0 (!%p114_p2), %v687_v0  ;;  %663 = vmatprep.subr.bf16.mxu1 (!%p114_p2), %v687_v0  ;;  %v690_v3 = vld [vmem:[%s785_s1 + $0x18] sm:$0xff] (!%p114_p2)   ;;  %v691_v6 = vld [vmem:[%s785_s1 + $0x20] sm:$0xff] (!%p114_p2)   ;;  %v692_v7 = vld [vmem:[%s785_s1 + $0x28] sm:$0xff] (!%p114_p2)  }
   0x7   : > { %632 = vmatpush3.bf16.msra.mxu0 (!%p114_p2), %v687_v0  ;;  %671 = vmatpush3.bf16.msra.mxu1 (!%p114_p2), %v687_v0  ;;  %v693_v8 = vld [vmem:[%s785_s1 + $0x30] sm:$0xff] (!%p114_p2)   ;;  %v694_v9 = vld [vmem:[%s785_s1 + $0x38] sm:$0xff] (!%p114_p2)  }
   0x8   : > { %633 = vmatprep.subr.bf16.mxu0 (!%p114_p2), %v688_v1  ;;  %664 = vmatprep.subr.bf16.mxu1 (!%p114_p2), %v688_v1 }
   0xb   : > { %634 = vmatpush3.bf16.msra.mxu0 (!%p114_p2), %v688_v1  ;;  %672 = vmatpush3.bf16.msra.mxu1 (!%p114_p2), %v688_v1 }
   0xc   : > { %635 = vmatprep.subr.bf16.mxu0 (!%p114_p2), %v689_v2  ;;  %665 = vmatprep.subr.bf16.mxu1 (!%p114_p2), %v689_v2 }
   0xd   : > { %s788_s13 = smov (!%p136_p3, %s514_s13), 47 }
   0xe   : > { %s515_s18 = sshll.u32 %s788_s13, 2 }
   0xf   : > { %s751_s21 = scalar_lea.vmem %s784_s0, %s515_s18  ;;  %636 = vmatpush3.bf16.msra.mxu0 %v689_v2  ;;  %673 = vmatpush3.bf16.msra.mxu1 %v689_v2  ;;  %s145_s6 = scalar_lea.vmem %s786_s2, %s515_s18 }
  0x10   : > { %v695_v4 = vld [vmem:[%s751_s21] sm:$0xff]   ;;  %637 = vmatprep.subr.bf16.mxu0 %v690_v3  ;;  %666 = vmatprep.subr.bf16.mxu1 %v690_v3  ;;  %v697_v10 = vld [vmem:[%s751_s21 + $0x8] sm:$0xff]   ;;  %v699_v12 = vld [vmem:[%s751_s21 + $0x10] sm:$0xff]  }
  0x11   : > { %v696_v5 = vld [vmem:[%s751_s21 + $0x20] sm:$0xff]   ;;  %647 = vmatprep.mubr.bf16.mxu0 %v695_v4  ;;  %v698_v11 = vld [vmem:[%s751_s21 + $0x28] sm:$0xff]   ;;  %v700_v13 = vld [vmem:[%s751_s21 + $0x30] sm:$0xff]  }
  0x12   : > { %655 = vmatprep.mubr.bf16.mxu1 %v696_v5  ;;  %v701_v14 = vld [vmem:[%s751_s21 + $0x18] sm:$0xff]  }
  0x13   : > { %638 = vmatpush3.bf16.msra.mxu0 %v690_v3  ;;  %674 = vmatpush3.bf16.msra.mxu1 %v690_v3  ;;  %v702_v15 = vld [vmem:[%s751_s21 + $0x38] sm:$0xff]  }
  0x14   : > { %639 = vmatprep.subr.bf16.mxu0 %v691_v6  ;;  %667 = vmatprep.subr.bf16.mxu1 %v691_v6 }
  0x17   : > { %640 = vmatpush3.bf16.msra.mxu0 %v691_v6  ;;  %675 = vmatpush3.bf16.msra.mxu1 %v691_v6 }
  0x18   : > { %641 = vmatprep.subr.bf16.mxu0 %v692_v7  ;;  %668 = vmatprep.subr.bf16.mxu1 %v692_v7 }
  0x1b   : > { %642 = vmatpush3.bf16.msra.mxu0 %v692_v7  ;;  %676 = vmatpush3.bf16.msra.mxu1 %v692_v7 }
  0x1c   : > { %643 = vmatprep.subr.bf16.mxu0 %v693_v8  ;;  %669 = vmatprep.subr.bf16.mxu1 %v693_v8 }
  0x1f   : > { %644 = vmatpush3.bf16.msra.mxu0 %v693_v8  ;;  %677 = vmatpush3.bf16.msra.mxu1 %v693_v8 }
  0x20   : > { %645 = vmatprep.subr.bf16.mxu0 %v694_v9  ;;  %670 = vmatprep.subr.bf16.mxu1 %v694_v9 }
  0x23   : > { %646 = vmatpush3.bf16.msra.mxu0 %v694_v9  ;;  %678 = vmatpush3.bf16.msra.mxu1 %v694_v9 }
  0x26   : > { %648 = vmatmul.mubr.bf16.vlgmr.msra.gmra.mrb[0].mxu0 %v697_v10  ;;  %656 = vmatmul.mubr.bf16.vlgmr.msra.gmra.mrb[0].mxu1 %v698_v11 }
  0x27   : > { %651 = vmatprep.mubr.bf16.mxu0 %v699_v12  ;;  %659 = vmatprep.mubr.bf16.mxu1 %v700_v13 }
  0x2e   : > { %652 = vmatmul.mubr.bf16.gmra.mrb[4].mxu0 %v701_v14  ;;  %660 = vmatmul.mubr.bf16.gmra.mrb[4].mxu1 %v702_v15 }
  0xf9   : > { %v649_v16 = vpop.f32.mrb[0].mxu0  ;;  %v657_v17 = vpop.f32.mrb[0].mxu1 }
  0xfa   : > { %v310_v18 = vpop.f32.mrb[1].mxu0  ;;  %v342_v19 = vpop.f32.mrb[1].mxu1 }
  0xfb   : > { %v650_v20 = vpop.f32.mrb[2].mxu0  ;;  %v658_v21 = vpop.f32.mrb[2].mxu1 }
  0xfc   : > { %v576_v22 = vpack.c.bf16 %v650_v20, %v649_v16  ;;  %v596_v23 = vpack.c.bf16 %v658_v21, %v657_v17  ;;  %v313_v24 = vpop.f32.mrb[3].mxu0  ;;  %v345_v25 = vpop.f32.mrb[3].mxu1 }
  0xfd   : > { %v571_v26 = vpack.c.bf16 %v313_v24, %v310_v18  ;;  %v591_v27 = vpack.c.bf16 %v345_v25, %v342_v19 }
  0xfe   : > { %608 = vst [vmem:[%s145_s6 + $0x8] sm:$0xff] %v576_v22   ;;  %612 = vst [vmem:[%s145_s6 + $0x28] sm:$0xff] %v596_v23  }
  0xff   : > { %572 = vst [vmem:[%s145_s6] sm:$0xff] %v571_v26   ;;  %611 = vst [vmem:[%s145_s6 + $0x20] sm:$0xff] %v591_v27  }
 0x101   : > { %v653_v28 = vpop.f32.mrb[4].mxu0  ;;  %v661_v29 = vpop.f32.mrb[4].mxu1 }
 0x102   : > { %v326_v30 = vpop.f32.mrb[5].mxu0  ;;  %v358_v31 = vpop.f32.mrb[5].mxu1 }
 0x103   : > { %v654_v32 = vpop.f32.mrb[6].mxu0  ;;  %v662_v33 = vpop.f32.mrb[6].mxu1 }
 0x104   : > { %v586_v34 = vpack.c.bf16 %v654_v32, %v653_v28  ;;  %v606_v35 = vpack.c.bf16 %v662_v33, %v661_v29  ;;  %v329_v36 = vpop.f32.mrb[7].mxu0  ;;  %v361_v37 = vpop.f32.mrb[7].mxu1 }
 0x105   : > { %v581_v38 = vpack.c.bf16 %v329_v36, %v326_v30  ;;  %v601_v39 = vpack.c.bf16 %v361_v37, %v358_v31 }
 0x106   : > { %610 = vst [vmem:[%s145_s6 + $0x18] sm:$0xff] %v586_v34   ;;  %614 = vst [vmem:[%s145_s6 + $0x38] sm:$0xff] %v606_v35  }
 0x107   : > { %609 = vst [vmem:[%s145_s6 + $0x10] sm:$0xff] %v581_v38   ;;  %613 = vst [vmem:[%s145_s6 + $0x30] sm:$0xff] %v601_v39  }
 0x108 PF: > { %s12_s9 = sadd.s32 1, %s709_s9  }
 0x109   : > { %p9_p4 = scmp.ge.s32.totalorder %s12_s9, 5  }
 0x10b   :  { %11 = sbr.rel (!%p9_p4) target bundleno = 1 (0x1), region = 58 }

// kernel: gcn_forward.9
= control target key start
LH: loop header
LB: loop body
LE: loop exit
PB: predicated region body
PF: predicated region fallthrough
CT: control target
= control target key end

     0   :  { %s1040_s12 = smov 0   ;;  %s1042_s13 = smov 0   ;;  %s1163_s0 = inlined_call_operand.vmem [shape: s8[384,384], index: 0, kind: input, shape index: {}]   ;;  %s1164_s1 = inlined_call_operand.vmem [shape: bf16[384,128], index: 1, kind: input, shape index: {}]   ;;  %s1165_s2 = inlined_call_operand.vmem [shape: f32[1,128], index: 2, kind: input, shape index: {}]   ;;  %s1166_s3 = inlined_call_operand.vmem [shape: bf16[384,128], index: 3, kind: output, shape index: {}]  }
   0x1   :  { %s1044_s14 = smov 0   ;;  %s1046_s15 = smov 0  }
   0x2   :  { %s1048_s16 = smov 0   ;;  %s1050_s17 = smov 0  }
   0x3   :  { %s1052_s18 = smov 0  }
   0x4 LB: > { %s22_s19 = sadd.s32 1, %s1009_s16  ;;  %s25_s20 = sadd.s32 1, %s1013_s17  ;;  %s1017_s18 = sphi %s1052_s18, %s13_s18   ;;  %s1013_s17 = sphi %s1050_s17, %s1172_s17   ;;  %s1009_s16 = sphi %s1048_s16, %s1171_s16   ;;  %s1005_s15 = sphi %s1046_s15, %s1170_s15   ;;  %s1001_s14 = sphi %s1044_s14, %s1169_s14   ;;  %s997_s13 = sphi %s1042_s13, %s1168_s13   ;;  %s993_s12 = sphi %s1040_s12, %s1167_s12  }
   0x5   : > { %p23_p0 = scmp.ge.s32.totalorder %s22_s19, 3  ;;  %p41_p1 = scmp.ne.s32.totalorder %s997_s13, %s993_s12 }
   0x6   : > { %p42_p2 = scmp.eq.s32.totalorder %s1017_s18, 0  ;;  %s34_s24 = sadd.s32 1, %s997_s13 }
   0x7   : > { %s1174_s19 = smov (%p23_p0, %s22_s19), 0  ;;  %s1176_s20 = smov (!%p23_p0, %s25_s20), %s1013_s17 }
   0x8   : > { %p43_p3 = por %p42_p2, %p41_p1  ;;  %p27_p4 = scmp.ge.s32.totalorder %s1176_s20, 3 }
   0x9   : > { %s30_s21 = ssub.s32 %s1009_s16, %s1174_s19  ;;  %p730_p6 = scmp.ge.s32.totalorder %s1017_s18, 9 }
   0xa   : > { %s1178_s20 = smov (%p27_p4, %s1176_s20), 0 }
   0xb   : > { %s29_s22 = ssub.s32 %s1013_s17, %s1178_s20  ;;  %143 = sbr.rel (%p730_p6) target bundleno = 27 (0x1b), region = 20 }
   0xc   : > { %s31_s23 = sor.u32 %s30_s21, %s29_s22 }
   0xd   : > { %p32_p5 = scmp.eq.s32.totalorder %s31_s23, 0 }
   0xf   : > { %s1091_s25 = scalar_select %p32_p5, %s997_s13, %s34_s24  }
  0x12   : > { %146 = sbr.rel (!%p43_p3) target bundleno = 27 (0x1b), region = 24  ;;  %s148_s26 = sand.u32 (%p43_p3), 1, %s997_s13  }
  0x13   : > { %s897_s27 = smul.u32 (%p43_p3), 12, %s1013_s17  ;;  %s731_s28 = sshll.u32 (%p43_p3), %s148_s26, 5 }
  0x14   : > { %s150_s7 = scalar_lea.vmem (%p43_p3), [#allocation3], %s731_s28 }
  0x15   : > { %s153_s29 = sadd.s32 (%p43_p3), %s1009_s16, %s897_s27 }
  0x16   : > { %s734_s30 = sshll.u32 (%p43_p3), %s153_s29, 3 }
  0x17   : > { %s155_s6 = scalar_lea.vmem (%p43_p3), %s1163_s0, %s734_s30 }
  0x18   : > { %v189_v0 = vld [vmem:[%s155_s6] sm:$0xff] (%p43_p3)  ;;  %v191_v1 = vld [vmem:[%s155_s6 + $0x18] sm:$0xff] (%p43_p3)  ;;  %v193_v2 = vld [vmem:[%s155_s6 + $0x30] sm:$0xff] (%p43_p3) }
  0x19   : > { %190 = vst [vmem:[%s150_s7] sm:$0xff] %v189_v0  ;;  %192 = vst [vmem:[%s150_s7 + $0x8] sm:$0xff] %v191_v1  ;;  %v195_v3 = vld [vmem:[%s155_s6 + $0x48] sm:$0xff] }
  0x1a   : > { %194 = vst [vmem:[%s150_s7 + $0x10] sm:$0xff] %v193_v2  ;;  %196 = vst [vmem:[%s150_s7 + $0x18] sm:$0xff] %v195_v3 }
  0x1b PF: > { %p735_p7 = scmp.ge.s32.totalorder %s1017_s18, 1  ;;  %p210_p8 = scmp.lt.s32.totalorder %s1017_s18, 10 }
  0x1d   : > { %p211_p9 = pnand %p735_p7, %p210_p8 }
  0x1e   : > { %s217_s8 = sand.u32 (!%p211_p9), 1, %s993_s12   ;;  %s737_s9 = sshll.u32 (!%p211_p9), %s1001_s14, 4 }
  0x1f   : > { %214 = sbr.rel (%p211_p9) target bundleno = 322 (0x142), region = 66  ;;  %s736_s10 = sshll.u32 (!%p211_p9), %s217_s8, 5 }
  0x20   : > { %p247_p10 = scmp.lt.s32.totalorder (!%p211_p9), %s737_s9, 47  ;;  %s739_s11 = sshll.u32 (!%p211_p9), %s1005_s15, 4 }
  0x21   : > { %p253_p11 = scmp.lt.s32.totalorder (!%p211_p9), %s739_s11, 47  ;;  %s1115_s12 = scalar_lea.vmem (!%p211_p9), [#allocation3], %s736_s10 }
  0x22   : > { %p741_p12 = scmp.ne.s32.totalorder (!%p211_p9), %s1001_s14, 0 }
  0x26   : > { %s1180_s9 = smov (!%p247_p10, %s737_s9), 47  ;;  %s1182_s11 = smov (!%p253_p11, %s739_s11), 47 }
  0x27   : > { %s738_s21 = sshll.u32 %s1180_s9, 2  ;;  %s740_s26 = sshll.u32 %s1182_s11, 2  ;;  %v1019_v4 = vmov (!%p741_p12), 0.0  }
  0x28   : > { %s1108_s24 = scalar_lea.vmem %s1164_s1, %s738_s21  ;;  %s1113_s29 = scalar_lea.vmem %s1166_s3, %s740_s26  ;;  %263 = vst [vmem:[#allocation2] sm:$0xff] (!%p741_p12), %v1019_v4  ;;  %264 = vst [vmem:[#allocation2 + $0x8] sm:$0xff] (!%p741_p12), %v1019_v4 }
  0x29   : > { %262 = sbr.rel (%p741_p12) target bundleno = 48 (0x30), region = 74  ;;  %265 = vst [vmem:[#allocation2 + $0x10] sm:$0xff] (!%p741_p12), %v1019_v4  ;;  %266 = vst [vmem:[#allocation2 + $0x18] sm:$0xff] (!%p741_p12), %v1019_v4 }
  0x2a   : > { %267 = vst [vmem:[#allocation2 + $0x20] sm:$0xff] (!%p741_p12), %v1019_v4  ;;  %268 = vst [vmem:[#allocation2 + $0x28] sm:$0xff] (!%p741_p12), %v1019_v4 }
  0x2b   : > { %269 = vst [vmem:[#allocation2 + $0x30] sm:$0xff] (!%p741_p12), %v1019_v4  ;;  %270 = vst [vmem:[#allocation2 + $0x38] sm:$0xff] (!%p741_p12), %v1019_v4 }
  0x2c   : > { %271 = vst [vmem:[#allocation2 + $0x40] sm:$0xff] (!%p741_p12), %v1019_v4  ;;  %272 = vst [vmem:[#allocation2 + $0x48] sm:$0xff] (!%p741_p12), %v1019_v4 }
  0x2d   : > { %273 = vst [vmem:[#allocation2 + $0x50] sm:$0xff] (!%p741_p12), %v1019_v4  ;;  %274 = vst [vmem:[#allocation2 + $0x58] sm:$0xff] (!%p741_p12), %v1019_v4 }
  0x2e   : > { %275 = vst [vmem:[#allocation2 + $0x60] sm:$0xff] (!%p741_p12), %v1019_v4  ;;  %276 = vst [vmem:[#allocation2 + $0x68] sm:$0xff] (!%p741_p12), %v1019_v4 }
  0x2f   : > { %277 = vst [vmem:[#allocation2 + $0x70] sm:$0xff] (!%p741_p12), %v1019_v4  ;;  %278 = vst [vmem:[#allocation2 + $0x78] sm:$0xff] (!%p741_p12), %v1019_v4 }
  0x30 PF: > { %v955_v5 = vld [vmem:[%s1108_s24] sm:$0xff]   ;;  %v956_v6 = vld [vmem:[%s1108_s24 + $0x8] sm:$0xff]   ;;  %v957_v7 = vld [vmem:[%s1108_s24 + $0x10] sm:$0xff]   ;;  %p750_p13 = scmp.ne.s32.totalorder %s1001_s14, 2 }
  0x31   : > { %849 = vmatprep.subr.bf16.mxu0 %v955_v5  ;;  %881 = vmatprep.subr.bf16.mxu1 %v955_v5  ;;  %v958_v8 = vld [vmem:[%s1108_s24 + $0x18] sm:$0xff]   ;;  %v279_v9 = vld [vmem:[%s1115_s12] sm:$0xff]  ;;  %v281_v10 = vld [vmem:[%s1115_s12 + $0x10] sm:$0xff] }
  0x32   : > { %850 = vmatpush3.bf16.msra.mxu0 %v955_v5  ;;  %889 = vmatpush3.bf16.msra.mxu1 %v955_v5  ;;  %v283_v11 = vunpack.c.l.s8.bf16 %v279_v9  ;;  %v287_v12 = vunpack.c.l.s8.bf16 %v281_v10  ;;  %v959_v13 = vld [vmem:[%s1108_s24 + $0x20] sm:$0xff]   ;;  %v960_v14 = vld [vmem:[%s1108_s24 + $0x28] sm:$0xff]   ;;  %v961_v15 = vld [vmem:[%s1108_s24 + $0x30] sm:$0xff]   ;;  %v284_v19 = vunpack.c.h.s8.bf16 %v279_v9  ;;  %v288_v20 = vunpack.c.h.s8.bf16 %v281_v10 }
  0x33   : > { %851 = vmatprep.subr.bf16.mxu0 %v956_v6  ;;  %882 = vmatprep.subr.bf16.mxu1 %v956_v6  ;;  %v962_v16 = vld [vmem:[%s1108_s24 + $0x38] sm:$0xff]   ;;  %v280_v17 = vld [vmem:[%s1115_s12 + $0x8] sm:$0xff]  ;;  %v293_v25 = vld [vmem:[#allocation2 + $0x10] sm:$0xff] }
  0x34   : > { %865 = vmatprep.mubr.bf16.mxu0 %v283_v11  ;;  %873 = vmatprep.mubr.bf16.mxu1 %v287_v12  ;;  %v282_v18 = vld [vmem:[%s1115_s12 + $0x18] sm:$0xff]  ;;  %v285_v21 = vunpack.c.l.s8.bf16 %v280_v17  ;;  %v286_v23 = vunpack.c.h.s8.bf16 %v280_v17  ;;  %v301_v26 = vld [vmem:[#allocation2 + $0x50] sm:$0xff]  ;;  %v291_v27 = vld [vmem:[#allocation2] sm:$0xff] }
  0x35   : > { %v289_v22 = vunpack.c.l.s8.bf16 %v282_v18  ;;  %v290_v24 = vunpack.c.h.s8.bf16 %v282_v18  ;;  %v299_v28 = vld [vmem:[#allocation2 + $0x40] sm:$0xff]  ;;  %v294_v31 = vld [vmem:[#allocation2 + $0x18] sm:$0xff]  ;;  %v292_v37 = vld [vmem:[#allocation2 + $0x8] sm:$0xff] }
  0x36   : > { %852 = vmatpush3.bf16.msra.mxu0 %v956_v6  ;;  %890 = vmatpush3.bf16.msra.mxu1 %v956_v6  ;;  %v302_v32 = vld [vmem:[#allocation2 + $0x58] sm:$0xff]  ;;  %v300_v38 = vld [vmem:[#allocation2 + $0x48] sm:$0xff]  ;;  %v297_v49 = vld [vmem:[#allocation2 + $0x30] sm:$0xff] }
  0x37   : > { %853 = vmatprep.subr.bf16.mxu0 %v957_v7  ;;  %883 = vmatprep.subr.bf16.mxu1 %v957_v7  ;;  %v305_v50 = vld [vmem:[#allocation2 + $0x70] sm:$0xff]  ;;  %v295_v51 = vld [vmem:[#allocation2 + $0x20] sm:$0xff]  ;;  %v298_v55 = vld [vmem:[#allocation2 + $0x38] sm:$0xff] }
  0x38   : > { %v303_v52 = vld [vmem:[#allocation2 + $0x60] sm:$0xff]  ;;  %v306_v56 = vld [vmem:[#allocation2 + $0x78] sm:$0xff]  ;;  %v296_v61 = vld [vmem:[#allocation2 + $0x28] sm:$0xff] }
  0x39   : > { %v304_v62 = vld [vmem:[#allocation2 + $0x68] sm:$0xff]  ;;  %v751_v11 = vld [vmem:[%s1165_s2] ss:$0 sm:$0xff] (!%p750_p13) }
  0x3a   : > { %854 = vmatpush3.bf16.msra.mxu0 %v957_v7  ;;  %891 = vmatpush3.bf16.msra.mxu1 %v957_v7 }
  0x3b   : > { %855 = vmatprep.subr.bf16.mxu0 %v958_v8  ;;  %884 = vmatprep.subr.bf16.mxu1 %v958_v8 }
  0x3e   : > { %856 = vmatpush3.bf16.msra.mxu0 %v958_v8  ;;  %892 = vmatpush3.bf16.msra.mxu1 %v958_v8 }
  0x3f   : > { %857 = vmatprep.subr.bf16.mxu0 %v959_v13  ;;  %885 = vmatprep.subr.bf16.mxu1 %v959_v13 }
  0x42   : > { %858 = vmatpush3.bf16.msra.mxu0 %v959_v13  ;;  %893 = vmatpush3.bf16.msra.mxu1 %v959_v13 }
  0x43   : > { %859 = vmatprep.subr.bf16.mxu0 %v960_v14  ;;  %886 = vmatprep.subr.bf16.mxu1 %v960_v14 }
  0x46   : > { %860 = vmatpush3.bf16.msra.mxu0 %v960_v14  ;;  %894 = vmatpush3.bf16.msra.mxu1 %v960_v14 }
  0x47   : > { %861 = vmatprep.subr.bf16.mxu0 %v961_v15  ;;  %887 = vmatprep.subr.bf16.mxu1 %v961_v15 }
  0x4a   : > { %862 = vmatpush3.bf16.msra.mxu0 %v961_v15  ;;  %895 = vmatpush3.bf16.msra.mxu1 %v961_v15 }
  0x4b   : > { %863 = vmatprep.subr.bf16.mxu0 %v962_v16  ;;  %888 = vmatprep.subr.bf16.mxu1 %v962_v16 }
  0x4e   : > { %864 = vmatpush3.bf16.msra.mxu0 %v962_v16  ;;  %896 = vmatpush3.bf16.msra.mxu1 %v962_v16 }
  0x51   : > { %866 = vmatmul.mubr.bf16.vlgmr.msra.gmra.mrb[0].mxu0 %v284_v19  ;;  %874 = vmatmul.mubr.bf16.vlgmr.msra.gmra.mrb[0].mxu1 %v288_v20 }
  0x52   : > { %869 = vmatprep.mubr.bf16.mxu0 %v285_v21  ;;  %877 = vmatprep.mubr.bf16.mxu1 %v289_v22 }
  0x59   : > { %870 = vmatmul.mubr.bf16.gmra.mrb[4].mxu0 %v286_v23  ;;  %878 = vmatmul.mubr.bf16.gmra.mrb[4].mxu1 %v290_v24 }
 0x124   : > { %v867_v29 = vpop.f32.mrb[0].mxu0  ;;  %v875_v30 = vpop.f32.mrb[0].mxu1 }
 0x125   : > { %v470_v33 = vadd.f32 %v867_v29, %v293_v25  ;;  %v478_v34 = vadd.f32 %v875_v30, %v301_v26  ;;  %v405_v35 = vpop.f32.mrb[1].mxu0  ;;  %v437_v36 = vpop.f32.mrb[1].mxu1 }
 0x126   : > { %v468_v39 = vadd.f32 %v405_v35, %v291_v27  ;;  %v476_v40 = vadd.f32 %v437_v36, %v299_v28  ;;  %v868_v41 = vpop.f32.mrb[2].mxu0  ;;  %v876_v42 = vpop.f32.mrb[2].mxu1 }
 0x127   : > { %486 = vst [vmem:[#allocation2 + $0x10] sm:$0xff] %v470_v33  ;;  %494 = vst [vmem:[#allocation2 + $0x50] sm:$0xff] %v478_v34  ;;  %v471_v43 = vadd.f32 %v868_v41, %v294_v31  ;;  %v479_v44 = vadd.f32 %v876_v42, %v302_v32  ;;  %v408_v45 = vpop.f32.mrb[3].mxu0  ;;  %v440_v46 = vpop.f32.mrb[3].mxu1 }
 0x128   : > { %484 = vst [vmem:[#allocation2] sm:$0xff] %v468_v39  ;;  %492 = vst [vmem:[#allocation2 + $0x40] sm:$0xff] %v476_v40  ;;  %v469_v47 = vadd.f32 %v408_v45, %v292_v37  ;;  %v477_v48 = vadd.f32 %v440_v46, %v300_v38 }
 0x129   : > { %487 = vst [vmem:[#allocation2 + $0x18] sm:$0xff] %v471_v43  ;;  %495 = vst [vmem:[#allocation2 + $0x58] sm:$0xff] %v479_v44 }
 0x12a   : > { %485 = vst [vmem:[#allocation2 + $0x8] sm:$0xff] %v469_v47  ;;  %493 = vst [vmem:[#allocation2 + $0x48] sm:$0xff] %v477_v48 }
 0x12c   : > { %v871_v53 = vpop.f32.mrb[4].mxu0  ;;  %v879_v54 = vpop.f32.mrb[4].mxu1  ;;  %503 = sbr.rel (%p750_p13) target bundleno = 322 (0x142), region = 78 }
 0x12d   : > { %v474_v57 = vadd.f32 %v871_v53, %v297_v49  ;;  %v482_v58 = vadd.f32 %v879_v54, %v305_v50  ;;  %v421_v59 = vpop.f32.mrb[5].mxu0  ;;  %v453_v60 = vpop.f32.mrb[5].mxu1 }
 0x12e   : > { %v472_v63 = vadd.f32 %v421_v59, %v295_v51  ;;  %v480_v0 = vadd.f32 %v453_v60, %v303_v52  ;;  %v872_v1 = vpop.f32.mrb[6].mxu0  ;;  %v880_v2 = vpop.f32.mrb[6].mxu1  ;;  %v506_v14 = vld [vmem:[#allocation2 + $0x10] sm:$0xff] (!%p750_p13) }
 0x12f   : > { %490 = vst [vmem:[#allocation2 + $0x30] sm:$0xff] %v474_v57  ;;  %498 = vst [vmem:[#allocation2 + $0x70] sm:$0xff] %v482_v58  ;;  %v475_v3 = vadd.f32 %v872_v1, %v298_v55  ;;  %v483_v4 = vadd.f32 %v880_v2, %v306_v56  ;;  %v424_v5 = vpop.f32.mrb[7].mxu0  ;;  %v456_v6 = vpop.f32.mrb[7].mxu1  ;;  %v504_v9 = vld [vmem:[#allocation2] sm:$0xff] (!%p750_p13)  ;;  %v529_v17 = vadd.f32 (!%p750_p13), %v751_v11, %v506_v14  ;;  %v514_v29 = vld [vmem:[#allocation2 + $0x50] sm:$0xff] (!%p750_p13) }
 0x130   : > { %488 = vst [vmem:[#allocation2 + $0x20] sm:$0xff] %v472_v63  ;;  %496 = vst [vmem:[#allocation2 + $0x60] sm:$0xff] %v480_v0  ;;  %v473_v7 = vadd.f32 %v424_v5, %v296_v61  ;;  %v481_v8 = vadd.f32 %v456_v6, %v304_v62  ;;  %v527_v12 = vadd.f32 (!%p750_p13), %v751_v11, %v504_v9  ;;  %v507_v15 = vld [vmem:[#allocation2 + $0x18] sm:$0xff] (!%p750_p13)  ;;  %v512_v27 = vld [vmem:[#allocation2 + $0x40] sm:$0xff] (!%p750_p13) }
 0x131   : > { %491 = vst [vmem:[#allocation2 + $0x38] sm:$0xff] %v475_v3  ;;  %499 = vst [vmem:[#allocation2 + $0x78] sm:$0xff] %v483_v4  ;;  %v505_v10 = vld [vmem:[#allocation2 + $0x8] sm:$0xff] (!%p750_p13)  ;;  %v530_v18 = vadd.f32 (!%p750_p13), %v751_v11, %v507_v15  ;;  %v545_v30 = vmax.f32 (!%p750_p13), %v529_v17, 0.0  ;;  %v515_v34 = vld [vmem:[#allocation2 + $0x58] sm:$0xff] (!%p750_p13)  ;;  %v535_v39 = vadd.f32 (!%p750_p13), %v751_v11, %v512_v27  ;;  %v537_v44 = vadd.f32 (!%p750_p13), %v751_v11, %v514_v29 }
 0x132   : > { %489 = vst [vmem:[#allocation2 + $0x28] sm:$0xff] %v473_v7  ;;  %497 = vst [vmem:[#allocation2 + $0x68] sm:$0xff] %v481_v8  ;;  %v528_v13 = vadd.f32 (!%p750_p13), %v751_v11, %v505_v10  ;;  %v543_v23 = vmax.f32 (!%p750_p13), %v527_v12, 0.0  ;;  %v513_v28 = vld [vmem:[#allocation2 + $0x48] sm:$0xff] (!%p750_p13)  ;;  %v538_v49 = vadd.f32 (!%p750_p13), %v751_v11, %v515_v34 }
 0x133   : > { %v546_v31 = vmax.f32 %v530_v18, 0.0  ;;  %v536_v43 = vadd.f32 %v751_v11, %v513_v28  ;;  %v551_v48 = vmax.f32 %v535_v39, 0.0  ;;  %v553_v53 = vmax.f32 %v537_v44, 0.0 }
 0x134   : > { %v544_v24 = vmax.f32 %v528_v13, 0.0  ;;  %v554_v55 = vmax.f32 %v538_v49, 0.0 }
 0x135   : > { %v794_v41 = vpack.c.bf16 %v546_v31, %v545_v30  ;;  %v552_v52 = vmax.f32 %v536_v43, 0.0 }
 0x136   : > { %v510_v21 = vld [vmem:[#allocation2 + $0x30] sm:$0xff]  ;;  %v789_v36 = vpack.c.bf16 %v544_v24, %v543_v23  ;;  %v814_v61 = vpack.c.bf16 %v554_v55, %v553_v53 }
 0x137   : > { %v508_v16 = vld [vmem:[#allocation2 + $0x20] sm:$0xff]  ;;  %v533_v26 = vadd.f32 %v751_v11, %v510_v21  ;;  %v518_v45 = vld [vmem:[#allocation2 + $0x70] sm:$0xff]  ;;  %826 = vst [vmem:[%s1113_s29 + $0x8] sm:$0xff] %v794_v41   ;;  %v809_v59 = vpack.c.bf16 %v552_v52, %v551_v48 }
 0x138   : > { %v531_v20 = vadd.f32 %v751_v11, %v508_v16  ;;  %v511_v22 = vld [vmem:[#allocation2 + $0x38] sm:$0xff]  ;;  %v516_v35 = vld [vmem:[#allocation2 + $0x60] sm:$0xff]  ;;  %790 = vst [vmem:[%s1113_s29] sm:$0xff] %v789_v36   ;;  %v541_v57 = vadd.f32 %v751_v11, %v518_v45  ;;  %830 = vst [vmem:[%s1113_s29 + $0x28] sm:$0xff] %v814_v61  }
 0x139   : > { %v509_v19 = vld [vmem:[#allocation2 + $0x28] sm:$0xff]  ;;  %v534_v33 = vadd.f32 %v751_v11, %v511_v22  ;;  %v549_v38 = vmax.f32 %v533_v26, 0.0  ;;  %v519_v46 = vld [vmem:[#allocation2 + $0x78] sm:$0xff]  ;;  %v539_v50 = vadd.f32 %v751_v11, %v516_v35  ;;  %829 = vst [vmem:[%s1113_s29 + $0x20] sm:$0xff] %v809_v59  }
 0x13a   : > { %v532_v25 = vadd.f32 %v751_v11, %v509_v19  ;;  %v547_v32 = vmax.f32 %v531_v20, 0.0  ;;  %v517_v40 = vld [vmem:[#allocation2 + $0x68] sm:$0xff]  ;;  %v542_v58 = vadd.f32 %v751_v11, %v519_v46  ;;  %v557_v62 = vmax.f32 %v541_v57, 0.0 }
 0x13b   : > { %v550_v42 = vmax.f32 %v534_v33, 0.0  ;;  %v540_v54 = vadd.f32 %v751_v11, %v517_v40  ;;  %v555_v56 = vmax.f32 %v539_v50, 0.0 }
 0x13c   : > { %v548_v37 = vmax.f32 %v532_v25, 0.0  ;;  %v558_v63 = vmax.f32 %v542_v58, 0.0 }
 0x13d   : > { %v804_v51 = vpack.c.bf16 %v550_v42, %v549_v38  ;;  %v556_v60 = vmax.f32 %v540_v54, 0.0 }
 0x13e   : > { %v799_v47 = vpack.c.bf16 %v548_v37, %v547_v32  ;;  %v824_v1 = vpack.c.bf16 %v558_v63, %v557_v62 }
 0x13f   : > { %828 = vst [vmem:[%s1113_s29 + $0x18] sm:$0xff] %v804_v51   ;;  %v819_v0 = vpack.c.bf16 %v556_v60, %v555_v56 }
 0x140   : > { %827 = vst [vmem:[%s1113_s29 + $0x10] sm:$0xff] %v799_v47   ;;  %832 = vst [vmem:[%s1113_s29 + $0x38] sm:$0xff] %v824_v1  }
 0x141   : > { %831 = vst [vmem:[%s1113_s29 + $0x30] sm:$0xff] %v819_v0  }
 0x142 PF: > { %s13_s18 = sadd.s32 1, %s1017_s18   ;;  %s1167_s12 = smov %s997_s13 }
 0x143   : > { %p10_p0 = scmp.ge.s32.totalorder %s13_s18, 11   ;;  %s1168_s13 = smov %s1091_s25 }
 0x144   : > { %s1169_s14 = smov %s1009_s16  ;;  %s1170_s15 = smov %s1013_s17 }
 0x145   : > { %s1171_s16 = smov %s1174_s19  ;;  %s1172_s17 = smov %s1178_s20 }
 0x146   :  { %12 = sbr.rel (!%p10_p0) target bundleno = 4 (0x4), region = 116 }

// kernel: gcn_forward.8
= control target key start
LH: loop header
LB: loop body
LE: loop exit
PB: predicated region body
PF: predicated region fallthrough
CT: control target
= control target key end

     0   :  { %s883_s9 = smov 0   ;;  %s980_s0 = inlined_call_operand.vmem [shape: bf16[384,256], index: 0, kind: input, shape index: {}]   ;;  %s981_s1 = inlined_call_operand.vmem [shape: bf16[256,128], index: 1, kind: input, shape index: {}]   ;;  %s982_s2 = inlined_call_operand.vmem [shape: bf16[384,128], index: 2, kind: output, shape index: {}]  }
   0x1 LB: > { %s608_s10 = sadd.s32 4294967295, %s866_s9   ;;  %p612_p0 = scmp.ge.s32.totalorder %s866_s9, 1  ;;  %s866_s9 = sphi %s883_s9, %s12_s9  }
   0x2   : > { %p114_p1 = scmp.lt.s32.totalorder %s866_s9, 4 }
   0x4   : > { %p115_p2 = pnand %p612_p0, %p114_p1 }
   0x5   : > { %v820_v0 = vld [vmem:[%s981_s1 + $0x40] sm:$0xff] (!%p115_p2)   ;;  %s613_s13 = sshll.u32 (!%p115_p2), %s608_s10, 4  ;;  %v822_v2 = vld [vmem:[%s981_s1 + $0x48] sm:$0xff] (!%p115_p2)   ;;  %v824_v4 = vld [vmem:[%s981_s1 + $0x50] sm:$0xff] (!%p115_p2)  }
   0x6   : > { %118 = sbr.rel (%p115_p2) target bundleno = 282 (0x11a), region = 28  ;;  %v821_v1 = vld [vmem:[%s981_s1] sm:$0xff] (!%p115_p2)   ;;  %732 = vmatprep.subr.bf16.mxu0 (!%p115_p2), %v820_v0  ;;  %796 = vmatprep.subr.bf16.mxu1 (!%p115_p2), %v820_v0  ;;  %v823_v3 = vld [vmem:[%s981_s1 + $0x8] sm:$0xff] (!%p115_p2)   ;;  %p138_p3 = scmp.lt.s32.totalorder (!%p115_p2), %s613_s13, 47  ;;  %v825_v5 = vld [vmem:[%s981_s1 + $0x10] sm:$0xff] (!%p115_p2)  }
   0x7   : > { %733 = vmatpush3.bf16.msra.mxu0 (!%p115_p2), %v821_v1  ;;  %804 = vmatpush3.bf16.msra.mxu1 (!%p115_p2), %v821_v1  ;;  %v826_v6 = vld [vmem:[%s981_s1 + $0x58] sm:$0xff] (!%p115_p2)   ;;  %v828_v8 = vld [vmem:[%s981_s1 + $0x60] sm:$0xff] (!%p115_p2)   ;;  %v830_v10 = vld [vmem:[%s981_s1 + $0x68] sm:$0xff] (!%p115_p2)  }
   0x8   : > { %734 = vmatprep.subr.bf16.mxu0 (!%p115_p2), %v822_v2  ;;  %797 = vmatprep.subr.bf16.mxu1 (!%p115_p2), %v822_v2  ;;  %v827_v7 = vld [vmem:[%s981_s1 + $0x18] sm:$0xff] (!%p115_p2)   ;;  %v829_v9 = vld [vmem:[%s981_s1 + $0x20] sm:$0xff] (!%p115_p2)   ;;  %v831_v13 = vld [vmem:[%s981_s1 + $0x28] sm:$0xff] (!%p115_p2)  }
   0x9   : > { %v832_v14 = vld [vmem:[%s981_s1 + $0x70] sm:$0xff] (!%p115_p2)   ;;  %v834_v16 = vld [vmem:[%s981_s1 + $0x78] sm:$0xff] (!%p115_p2)  }
   0xa   : > { %v833_v15 = vld [vmem:[%s981_s1 + $0x30] sm:$0xff] (!%p115_p2)   ;;  %v835_v17 = vld [vmem:[%s981_s1 + $0x38] sm:$0xff] (!%p115_p2)  }
   0xb   : > { %735 = vmatpush3.bf16.msra.mxu0 (!%p115_p2), %v823_v3  ;;  %805 = vmatpush3.bf16.msra.mxu1 (!%p115_p2), %v823_v3 }
   0xc   : > { %736 = vmatprep.subr.bf16.mxu0 (!%p115_p2), %v824_v4  ;;  %798 = vmatprep.subr.bf16.mxu1 (!%p115_p2), %v824_v4 }
   0xd   : > { %s984_s13 = smov (!%p138_p3, %s613_s13), 47 }
   0xe   : > { %s668_s28 = sshll.u32 %s984_s13, 3  ;;  %s617_s22 = sshll.u32 %s984_s13, 2 }
   0xf   : > { %737 = vmatpush3.bf16.msra.mxu0 %v825_v5  ;;  %806 = vmatpush3.bf16.msra.mxu1 %v825_v5  ;;  %s924_s5 = scalar_lea.vmem %s980_s0, %s668_s28  ;;  %s967_s25 = scalar_lea.vmem %s982_s2, %s617_s22 }
  0x10   : > { %738 = vmatprep.subr.bf16.mxu0 %v826_v6  ;;  %799 = vmatprep.subr.bf16.mxu1 %v826_v6  ;;  %v838_v11 = vld [vmem:[%s924_s5 + $0x4] ss:$8 sps:$4 sm:$0xff]   ;;  %v836_v18 = vld [vmem:[%s924_s5] ss:$8 sps:$4 sm:$0xff]   ;;  %v842_v20 = vld [vmem:[%s924_s5 + $0x14] ss:$8 sps:$4 sm:$0xff]  }
  0x11   : > { %v841_v12 = vld [vmem:[%s924_s5 + $0x44] ss:$8 sps:$4 sm:$0xff]   ;;  %407 = vmatprep.mubr.bf16.mxu0 %v838_v11  ;;  %v839_v19 = vld [vmem:[%s924_s5 + $0x40] ss:$8 sps:$4 sm:$0xff]   ;;  %v844_v21 = vld [vmem:[%s924_s5 + $0x54] ss:$8 sps:$4 sm:$0xff]  }
  0x12   : > { %439 = vmatprep.mubr.bf16.mxu1 %v841_v12  ;;  %v846_v22 = vld [vmem:[%s924_s5 + $0x10] ss:$8 sps:$4 sm:$0xff]   ;;  %v848_v24 = vld [vmem:[%s924_s5 + $0x24] ss:$8 sps:$4 sm:$0xff]   ;;  %v852_v26 = vld [vmem:[%s924_s5 + $0x20] ss:$8 sps:$4 sm:$0xff]  }
  0x13   : > { %739 = vmatpush3.bf16.msra.mxu0 %v827_v7  ;;  %807 = vmatpush3.bf16.msra.mxu1 %v827_v7  ;;  %v847_v23 = vld [vmem:[%s924_s5 + $0x50] ss:$8 sps:$4 sm:$0xff]   ;;  %v850_v25 = vld [vmem:[%s924_s5 + $0x64] ss:$8 sps:$4 sm:$0xff]   ;;  %v853_v27 = vld [vmem:[%s924_s5 + $0x60] ss:$8 sps:$4 sm:$0xff]  }
  0x14   : > { %740 = vmatprep.subr.bf16.mxu0 %v828_v8  ;;  %800 = vmatprep.subr.bf16.mxu1 %v828_v8  ;;  %v854_v28 = vld [vmem:[%s924_s5 + $0x34] ss:$8 sps:$4 sm:$0xff]   ;;  %v858_v30 = vld [vmem:[%s924_s5 + $0x30] ss:$8 sps:$4 sm:$0xff]  }
  0x15   : > { %v856_v29 = vld [vmem:[%s924_s5 + $0x74] ss:$8 sps:$4 sm:$0xff]   ;;  %v859_v31 = vld [vmem:[%s924_s5 + $0x70] ss:$8 sps:$4 sm:$0xff]  }
  0x17   : > { %741 = vmatpush3.bf16.msra.mxu0 %v829_v9  ;;  %808 = vmatpush3.bf16.msra.mxu1 %v829_v9 }
  0x18   : > { %742 = vmatprep.subr.bf16.mxu0 %v830_v10  ;;  %801 = vmatprep.subr.bf16.mxu1 %v830_v10 }
  0x1b   : > { %743 = vmatpush3.bf16.msra.mxu0 %v831_v13  ;;  %809 = vmatpush3.bf16.msra.mxu1 %v831_v13 }
  0x1c   : > { %744 = vmatprep.subr.bf16.mxu0 %v832_v14  ;;  %802 = vmatprep.subr.bf16.mxu1 %v832_v14 }
  0x1f   : > { %745 = vmatpush3.bf16.msra.mxu0 %v833_v15  ;;  %810 = vmatpush3.bf16.msra.mxu1 %v833_v15 }
  0x20   : > { %746 = vmatprep.subr.bf16.mxu0 %v834_v16  ;;  %803 = vmatprep.subr.bf16.mxu1 %v834_v16 }
  0x23   : > { %747 = vmatpush3.bf16.msra.mxu0 %v835_v17  ;;  %811 = vmatpush3.bf16.msra.mxu1 %v835_v17 }
  0x26   : > { %408 = vmatmul.mubr.bf16.vlgmr.msra.gmra.mrb[0].mxu0 %v836_v18  ;;  %440 = vmatmul.mubr.bf16.vlgmr.msra.gmra.mrb[0].mxu1 %v839_v19 }
  0x27   : > { %415 = vmatprep.mubr.bf16.mxu0 %v842_v20  ;;  %447 = vmatprep.mubr.bf16.mxu1 %v844_v21 }
  0x2e   : > { %416 = vmatmul.mubr.bf16.gmra.mrb[4].mxu0 %v846_v22  ;;  %448 = vmatmul.mubr.bf16.gmra.mrb[4].mxu1 %v847_v23 }
  0x2f   : > { %423 = vmatprep.mubr.bf16.mxu0 %v848_v24  ;;  %455 = vmatprep.mubr.bf16.mxu1 %v850_v25 }
  0x36   : > { %424 = vmatmul.mubr.bf16.gmra.mrb[8].mxu0 %v852_v26  ;;  %456 = vmatmul.mubr.bf16.gmra.mrb[8].mxu1 %v853_v27 }
  0x37   : > { %431 = vmatprep.mubr.bf16.mxu0 %v854_v28  ;;  %463 = vmatprep.mubr.bf16.mxu1 %v856_v29 }
  0x3e   : > { %432 = vmatmul.mubr.bf16.gmra.mrb[12].mxu0 %v858_v30  ;;  %464 = vmatmul.mubr.bf16.gmra.mrb[12].mxu1 %v859_v31 }
  0xf9   : > { %v748_v32 = vpop.f32.mrb[0].mxu0  ;;  %v772_v33 = vpop.f32.mrb[0].mxu1 }
  0xfa   : > { %v749_v34 = vpop.f32.mrb[1].mxu0  ;;  %v773_v35 = vpop.f32.mrb[1].mxu1 }
  0xfb   : > { %v750_v36 = vadd.f32 %v749_v34, %v748_v32  ;;  %v774_v37 = vadd.f32 %v773_v35, %v772_v33  ;;  %v751_v38 = vpop.f32.mrb[2].mxu0  ;;  %v775_v39 = vpop.f32.mrb[2].mxu1 }
  0xfc   : > { %v752_v40 = vpop.f32.mrb[3].mxu0  ;;  %v776_v41 = vpop.f32.mrb[3].mxu1 }
  0xfd   : > { %v753_v42 = vadd.f32 %v752_v40, %v751_v38  ;;  %v777_v43 = vadd.f32 %v776_v41, %v775_v39 }
  0xff   : > { %v688_v44 = vpack.c.bf16 %v753_v42, %v750_v36  ;;  %v708_v45 = vpack.c.bf16 %v777_v43, %v774_v37 }
 0x101   : > { %689 = vst [vmem:[%s967_s25] sm:$0xff] %v688_v44   ;;  %728 = vst [vmem:[%s967_s25 + $0x20] sm:$0xff] %v708_v45   ;;  %v754_v46 = vpop.f32.mrb[4].mxu0  ;;  %v778_v47 = vpop.f32.mrb[4].mxu1 }
 0x102   : > { %v755_v48 = vpop.f32.mrb[5].mxu0  ;;  %v779_v49 = vpop.f32.mrb[5].mxu1 }
 0x103   : > { %v756_v50 = vadd.f32 %v755_v48, %v754_v46  ;;  %v780_v51 = vadd.f32 %v779_v49, %v778_v47  ;;  %v757_v52 = vpop.f32.mrb[6].mxu0  ;;  %v781_v53 = vpop.f32.mrb[6].mxu1 }
 0x104   : > { %v758_v54 = vpop.f32.mrb[7].mxu0  ;;  %v782_v55 = vpop.f32.mrb[7].mxu1 }
 0x105   : > { %v759_v56 = vadd.f32 %v758_v54, %v757_v52  ;;  %v783_v57 = vadd.f32 %v782_v55, %v781_v53 }
 0x107   : > { %v693_v58 = vpack.c.bf16 %v759_v56, %v756_v50  ;;  %v713_v59 = vpack.c.bf16 %v783_v57, %v780_v51 }
 0x109   : > { %725 = vst [vmem:[%s967_s25 + $0x8] sm:$0xff] %v693_v58   ;;  %729 = vst [vmem:[%s967_s25 + $0x28] sm:$0xff] %v713_v59   ;;  %v760_v60 = vpop.f32.mrb[8].mxu0  ;;  %v784_v61 = vpop.f32.mrb[8].mxu1 }
 0x10a   : > { %v761_v62 = vpop.f32.mrb[9].mxu0  ;;  %v785_v63 = vpop.f32.mrb[9].mxu1 }
 0x10b   : > { %v762_v0 = vadd.f32 %v761_v62, %v760_v60  ;;  %v786_v1 = vadd.f32 %v785_v63, %v784_v61  ;;  %v763_v2 = vpop.f32.mrb[10].mxu0  ;;  %v787_v3 = vpop.f32.mrb[10].mxu1 }
 0x10c   : > { %v764_v4 = vpop.f32.mrb[11].mxu0  ;;  %v788_v5 = vpop.f32.mrb[11].mxu1 }
 0x10d   : > { %v765_v6 = vadd.f32 %v764_v4, %v763_v2  ;;  %v789_v7 = vadd.f32 %v788_v5, %v787_v3 }
 0x10f   : > { %v698_v8 = vpack.c.bf16 %v765_v6, %v762_v0  ;;  %v718_v9 = vpack.c.bf16 %v789_v7, %v786_v1 }
 0x111   : > { %726 = vst [vmem:[%s967_s25 + $0x10] sm:$0xff] %v698_v8   ;;  %730 = vst [vmem:[%s967_s25 + $0x30] sm:$0xff] %v718_v9   ;;  %v766_v10 = vpop.f32.mrb[12].mxu0  ;;  %v790_v11 = vpop.f32.mrb[12].mxu1 }
 0x112   : > { %v767_v12 = vpop.f32.mrb[13].mxu0  ;;  %v791_v13 = vpop.f32.mrb[13].mxu1 }
 0x113   : > { %v768_v14 = vadd.f32 %v767_v12, %v766_v10  ;;  %v792_v15 = vadd.f32 %v791_v13, %v790_v11  ;;  %v769_v16 = vpop.f32.mrb[14].mxu0  ;;  %v793_v17 = vpop.f32.mrb[14].mxu1 }
 0x114   : > { %v770_v18 = vpop.f32.mrb[15].mxu0  ;;  %v794_v19 = vpop.f32.mrb[15].mxu1 }
 0x115   : > { %v771_v20 = vadd.f32 %v770_v18, %v769_v16  ;;  %v795_v21 = vadd.f32 %v794_v19, %v793_v17 }
 0x117   : > { %v703_v22 = vpack.c.bf16 %v771_v20, %v768_v14  ;;  %v723_v23 = vpack.c.bf16 %v795_v21, %v792_v15 }
 0x119   : > { %727 = vst [vmem:[%s967_s25 + $0x18] sm:$0xff] %v703_v22   ;;  %731 = vst [vmem:[%s967_s25 + $0x38] sm:$0xff] %v723_v23  }
 0x11a PF: > { %s12_s9 = sadd.s32 1, %s866_s9  }
 0x11b   : > { %p9_p4 = scmp.ge.s32.totalorder %s12_s9, 5  }
 0x11d   :  { %11 = sbr.rel (!%p9_p4) target bundleno = 1 (0x1), region = 58 }

</bundles_post_ra>
